<compile_context>
chip_gen: v7x
topology: tpu7x:2x2x1
jax: 0.10.0
libtpu: 0.0.40
codegen_flags: <defaults>
</compile_context>

<pallas_src>
import functools

import jax
import jax.numpy as jnp
from jax import lax
from jax.experimental import pallas as pl
from jax.experimental.pallas import tpu as pltpu

_SUBLANE = 8


def _round_up(n, m):
    return ((n + m - 1) // m) * m


def _fused_mlp_kernel(*refs, config, compute_dtype):
    """refs = (x_ref, w0_ref, b0_ref, w1_ref, b1_ref, ..., o_ref)."""
    x_ref = refs[0]
    o_ref = refs[-1]
    param_refs = refs[1:-1]

    h = x_ref[...].astype(jnp.float32)
    idx = 0
    for name, _ in config:
        if name == "linear":
            w_ref = param_refs[idx]
            b_ref = param_refs[idx + 1]
            idx += 2
            # Weights are pre-transposed to [in, out] (and pre-cast if bf16), so the
            # matmul feeds the MXU in native [M,K]x[K,N] form with f32 accumulation.
            lhs = h.astype(compute_dtype)
            h = lax.dot_general(
                lhs, w_ref[...],
                dimension_numbers=(((1,), (0,)), ((), ())),
                preferred_element_type=jnp.float32,
            )
            h = h + b_ref[...]  # [1, out] broadcasts over batch; f32 epilogue.
        elif name == "relu":
            h = jnp.maximum(h, 0.0)
        elif name == "tanh":
            h = jnp.tanh(h)
        elif name == "sigmoid":
            # EUP-friendly form: tanh issues on the otherwise idle EUP slot.
            h = 0.5 * (jnp.tanh(0.5 * h) + 1.0)
    o_ref[...] = h.astype(o_ref.dtype)


def _choose_tile_b(batch, feats, resident_bytes, budget_bytes=40 << 20):
    """Largest batch tile (multiple of 8) that fits VMEM budget and leaves >=2 grid steps
    when the batch allows it (so both v7x TensorCores get work)."""
    b8 = _round_up(batch, _SUBLANE)
    if b8 <= _SUBLANE:
        cap = b8
    else:
        cap = _round_up(pl.cdiv(b8, 2), _SUBLANE)  # guarantee at least 2 grid steps
    # Per-row VMEM bytes: double-buffered in/out tiles + a few live f32 intermediates.
    per_row = 4 * (2 * feats[0] + 2 * feats[-1] + 3 * max(feats))
    avail = max(budget_bytes - resident_bytes - (2 << 20), 1 << 20)
    for tb in (2048, 1024, 512, 256, 128, 64, 32, 16, 8):
        if tb <= cap and tb * per_row <= avail:
            return tb
    return _SUBLANE


def init_params(config, key):
    """Deterministic re-implementation of Learner_2.__init__ parameter creation.

    Returns PyTorch-convention params: w [out_features, in_features], b [out_features].
    """
    params = []
    for name, param in config:
        if name == "linear":
            out_f, in_f = param
            key, sub = jax.random.split(key)
            # torch.nn.init.kaiming_normal_ defaults: fan_in mode, gain=sqrt(2)
            std = (2.0 / in_f) ** 0.5
            w = std * jax.random.normal(sub, (out_f, in_f), dtype=jnp.float32)
            b = jnp.zeros((out_f,), dtype=jnp.float32)
            params.append(w)
            params.append(b)
    return params


def prepare_params(params, config, weight_dtype=jnp.float32):
    """One-time host-side prep (hoisted out of the forward path):
    transpose weights to [in, out], reshape biases to [1, out], optional bf16 cast."""
    prepared = []
    idx = 0
    for name, param in config:
        if name == "linear":
            out_f, in_f = param
            w = jnp.asarray(params[idx], jnp.float32)       # [out, in] (PyTorch convention)
            b = jnp.asarray(params[idx + 1], jnp.float32)   # [out]
            idx += 2
            prepared.append(jnp.asarray(w.T, weight_dtype))           # [in, out]
            prepared.append(b.reshape(1, out_f).astype(jnp.float32))  # [1, out], f32 epilogue
    return prepared


def learner2_forward(x, prepared_params, config, *, compute_dtype=jnp.float32, tile_b=None):
    """Mirrors Learner_2.forward as one fused Pallas kernel over a batch grid."""
    x = jnp.asarray(x, jnp.float32)
    batch, in_f = x.shape

    feats = [in_f]
    for name, param in config:
        if name == "linear":
            feats.append(param[0])
    out_f = feats[-1]

    # Weights/biases are grid-invariant; count them (double-buffered by default pipeline).
    resident_bytes = 2 * sum(int(p.size) * p.dtype.itemsize for p in prepared_params)

    if tile_b is None:
        tile_b = _choose_tile_b(batch, feats, resident_bytes)
    b_pad = _round_up(max(batch, tile_b), tile_b)

    # Only the batch axis ever needs padding (to a tile multiple); feature axes stay logical.
    x_in = x
    if b_pad != batch:
        x_in = jnp.zeros((b_pad, in_f), x.dtype).at[:batch].set(x)

    grid = (b_pad // tile_b,)
    # Last block dim == full array dim everywhere -> legal regardless of 128 alignment,
    # and no inflated HBM traffic from lane padding.
    in_specs = [pl.BlockSpec((tile_b, in_f), lambda i: (i, 0))]
    for p in prepared_params:
        in_specs.append(pl.BlockSpec(p.shape, lambda i: (0, 0)))
    out_specs = pl.BlockSpec((tile_b, out_f), lambda i: (i, 0))

    per_row = 4 * (2 * in_f + 2 * out_f + 3 * max(feats))
    est = tile_b * per_row + resident_bytes
    vmem_limit = int(min(max(est + (4 << 20), 16 << 20), 48 << 20))  # safe on 64 MiB v7x

    kernel = functools.partial(
        _fused_mlp_kernel,
        config=tuple(config),
        compute_dtype=compute_dtype,
    )

    out = pl.pallas_call(
        kernel,
        out_shape=jax.ShapeDtypeStruct((b_pad, out_f), jnp.float32),
        grid=grid,
        in_specs=in_specs,
        out_specs=out_specs,
        compiler_params=pltpu.CompilerParams(
            dimension_semantics=("parallel",),
            vmem_limit_bytes=vmem_limit,
        ),
    )(x_in, *prepared_params)

    if b_pad != batch:
        out = out[:batch]
    return out


def _reference_forward(x, params, config):
    ref = x
    idx = 0
    for name, _ in config:
        if name == "linear":
            ref = ref @ params[idx].T + params[idx + 1]
            idx += 2
        elif name == "relu":
            ref = jnp.maximum(ref, 0.0)
        elif name == "tanh":
            ref = jnp.tanh(ref)
        elif name == "sigmoid":
            ref = jax.nn.sigmoid(ref)
    return ref


if __name__ == "__main__":
    # Small MLP config consistent with the module's ('linear', (out, in)) convention.
    config = [
        ("linear", (64, 32)),
        ("relu", None),
        ("linear", (64, 64)),
        ("tanh", None),
        ("linear", (16, 64)),
        ("sigmoid", None),
    ]

    key = jax.random.PRNGKey(0)
    key, xk = jax.random.split(key)
    x = jax.random.normal(xk, (8, 32), dtype=jnp.float32)
    params = init_params(config, key)

    # One-time param prep (hoisted out of the forward path).
    prep_f32 = prepare_params(params, config, weight_dtype=jnp.float32)

    # f32 path: tight tolerance.
    out = jax.block_until_ready(learner2_forward(x, prep_f32, config))
    ref = _reference_forward(x, params, config)
    assert out.shape == (8, 16), out.shape
    assert jnp.allclose(out, ref, atol=1e-5, rtol=1e-5)

    # Batch that is not a multiple of the tile: exercises batch padding + slice-back.
    key, xk2 = jax.random.split(key)
    x2 = jax.random.normal(xk2, (37, 32), dtype=jnp.float32)
    out2 = jax.block_until_ready(learner2_forward(x2, prep_f32, config))
    ref2 = _reference_forward(x2, params, config)
    assert out2.shape == (37, 16), out2.shape
    assert jnp.allclose(out2, ref2, atol=1e-5, rtol=1e-5)

    # Optional bf16-MXU path (weights pre-cast once on the host; f32 accumulation).
    prep_bf16 = prepare_params(params, config, weight_dtype=jnp.bfloat16)
    out_bf16 = jax.block_until_ready(
        learner2_forward(x, prep_bf16, config, compute_dtype=jnp.bfloat16)
    )
    assert out_bf16.shape == (8, 16), out_bf16.shape
    assert jnp.allclose(out_bf16, ref, atol=5e-2, rtol=5e-2)

    print("KERNEL_OK")
</pallas_src>

<mosaic_0001>
module attributes {stable_mosaic.version = 11 : i64} {
  func.func @_fused_mlp_kernel(%arg0: i32, %arg1: memref<8x32xf32, #tpu.memory_space<vmem>>, %arg2: memref<32x64xf32, #tpu.memory_space<vmem>>, %arg3: memref<1x64xf32, #tpu.memory_space<vmem>>, %arg4: memref<64x64xf32, #tpu.memory_space<vmem>>, %arg5: memref<1x64xf32, #tpu.memory_space<vmem>>, %arg6: memref<64x16xf32, #tpu.memory_space<vmem>>, %arg7: memref<1x16xf32, #tpu.memory_space<vmem>>, %arg8: memref<8x16xf32, #tpu.memory_space<vmem>>) attributes {dimension_semantics = [#tpu.dimension_semantics<parallel>], iteration_bounds = array<i64: 1>, scalar_prefetch = 0 : i64, scratch_operands = 0 : i64, tpu.core_type = #tpu.core_type<tc>, window_params = [{transform_indices = @transform_0, window_bounds = array<i64: 8, 32>}, {pipeline_mode = #tpu.pipeline_mode<synchronous>, transform_indices = @transform_1, window_bounds = array<i64: 32, 64>}, {pipeline_mode = #tpu.pipeline_mode<synchronous>, transform_indices = @transform_2, window_bounds = array<i64: 1, 64>}, {pipeline_mode = #tpu.pipeline_mode<synchronous>, transform_indices = @transform_3, window_bounds = array<i64: 64, 64>}, {pipeline_mode = #tpu.pipeline_mode<synchronous>, transform_indices = @transform_4, window_bounds = array<i64: 1, 64>}, {pipeline_mode = #tpu.pipeline_mode<synchronous>, transform_indices = @transform_5, window_bounds = array<i64: 64, 16>}, {pipeline_mode = #tpu.pipeline_mode<synchronous>, transform_indices = @transform_6, window_bounds = array<i64: 1, 16>}, {transform_indices = @transform_7, window_bounds = array<i64: 8, 16>}]} {
    %c0 = arith.constant 0 : index
    %c0_0 = arith.constant 0 : index
    %0 = vector.load %arg1[%c0, %c0_0] : memref<8x32xf32, #tpu.memory_space<vmem>>, vector<8x32xf32>
    %c0_1 = arith.constant 0 : index
    %c0_2 = arith.constant 0 : index
    %1 = vector.load %arg2[%c0_1, %c0_2] : memref<32x64xf32, #tpu.memory_space<vmem>>, vector<32x64xf32>
    %cst = arith.constant dense<0.000000e+00> : vector<8x64xf32>
    %2 = tpu.matmul %0, %1, %cst {dimension_numbers = #tpu.dot_dimension_numbers<[1], [0], [0], [1], [0, 0, 1, 1], [], []>} : vector<8x32xf32>, vector<32x64xf32>, vector<8x64xf32> -> vector<8x64xf32>
    %c0_3 = arith.constant 0 : index
    %c0_4 = arith.constant 0 : index
    %3 = vector.load %arg3[%c0_3, %c0_4] : memref<1x64xf32, #tpu.memory_space<vmem>>, vector<1x64xf32>
    %4 = vector.broadcast %3 : vector<1x64xf32> to vector<8x64xf32>
    %5 = arith.addf %2, %4 : vector<8x64xf32>
    %cst_5 = arith.constant 0.000000e+00 : f32
    %6 = vector.broadcast %cst_5 : f32 to vector<8x64xf32>
    %7 = arith.maximumf %5, %6 : vector<8x64xf32>
    %c0_6 = arith.constant 0 : index
    %c0_7 = arith.constant 0 : index
    %8 = vector.load %arg4[%c0_6, %c0_7] : memref<64x64xf32, #tpu.memory_space<vmem>>, vector<64x64xf32>
    %cst_8 = arith.constant dense<0.000000e+00> : vector<8x64xf32>
    %9 = tpu.matmul %7, %8, %cst_8 {dimension_numbers = #tpu.dot_dimension_numbers<[1], [0], [0], [1], [0, 0, 1, 1], [], []>} : vector<8x64xf32>, vector<64x64xf32>, vector<8x64xf32> -> vector<8x64xf32>
    %c0_9 = arith.constant 0 : index
    %c0_10 = arith.constant 0 : index
    %10 = vector.load %arg5[%c0_9, %c0_10] : memref<1x64xf32, #tpu.memory_space<vmem>>, vector<1x64xf32>
    %11 = vector.broadcast %10 : vector<1x64xf32> to vector<8x64xf32>
    %12 = arith.addf %9, %11 : vector<8x64xf32>
    %13 = math.tanh %12 : vector<8x64xf32>
    %c0_11 = arith.constant 0 : index
    %c0_12 = arith.constant 0 : index
    %14 = vector.load %arg6[%c0_11, %c0_12] : memref<64x16xf32, #tpu.memory_space<vmem>>, vector<64x16xf32>
    %cst_13 = arith.constant dense<0.000000e+00> : vector<8x16xf32>
    %15 = tpu.matmul %13, %14, %cst_13 {dimension_numbers = #tpu.dot_dimension_numbers<[1], [0], [0], [1], [0, 0, 1, 1], [], []>} : vector<8x64xf32>, vector<64x16xf32>, vector<8x16xf32> -> vector<8x16xf32>
    %c0_14 = arith.constant 0 : index
    %c0_15 = arith.constant 0 : index
    %16 = vector.load %arg7[%c0_14, %c0_15] : memref<1x16xf32, #tpu.memory_space<vmem>>, vector<1x16xf32>
    %17 = vector.broadcast %16 : vector<1x16xf32> to vector<8x16xf32>
    %18 = arith.addf %15, %17 : vector<8x16xf32>
    %cst_16 = arith.constant 5.000000e-01 : f32
    %19 = vector.broadcast %cst_16 : f32 to vector<8x16xf32>
    %20 = arith.mulf %19, %18 : vector<8x16xf32>
    %21 = math.tanh %20 : vector<8x16xf32>
    %cst_17 = arith.constant 1.000000e+00 : f32
    %22 = vector.broadcast %cst_17 : f32 to vector<8x16xf32>
    %23 = arith.addf %21, %22 : vector<8x16xf32>
    %cst_18 = arith.constant 5.000000e-01 : f32
    %24 = vector.broadcast %cst_18 : f32 to vector<8x16xf32>
    %25 = arith.mulf %24, %23 : vector<8x16xf32>
    %c0_19 = arith.constant 0 : index
    %c0_20 = arith.constant 0 : index
    %26 = vector.load %arg8[%c0_19, %c0_20] : memref<8x16xf32, #tpu.memory_space<vmem>>, vector<8x16xf32>
    tpu.vector_store %arg8[%c0_19, %c0_20], %25 {strides = array<i32>} : memref<8x16xf32, #tpu.memory_space<vmem>>, vector<8x16xf32>,
    return
  }
  func.func @transform_0(%arg0: i32) -> (i32, i32) {
    %c0_i32 = arith.constant 0 : i32
    %c0_i32_0 = arith.constant 0 : i32
    return %arg0, %c0_i32 : i32, i32
  }
  func.func @transform_1(%arg0: i32) -> (i32, i32) {
    %c0_i32 = arith.constant 0 : i32
    %c0_i32_0 = arith.constant 0 : i32
    %c0_i32_1 = arith.constant 0 : i32
    return %c0_i32, %c0_i32_0 : i32, i32
  }
  func.func @transform_2(%arg0: i32) -> (i32, i32) {
    %c0_i32 = arith.constant 0 : i32
    %c0_i32_0 = arith.constant 0 : i32
    %c0_i32_1 = arith.constant 0 : i32
    return %c0_i32, %c0_i32_0 : i32, i32
  }
  func.func @transform_3(%arg0: i32) -> (i32, i32) {
    %c0_i32 = arith.constant 0 : i32
    %c0_i32_0 = arith.constant 0 : i32
    %c0_i32_1 = arith.constant 0 : i32
    return %c0_i32, %c0_i32_0 : i32, i32
  }
  func.func @transform_4(%arg0: i32) -> (i32, i32) {
    %c0_i32 = arith.constant 0 : i32
    %c0_i32_0 = arith.constant 0 : i32
    %c0_i32_1 = arith.constant 0 : i32
    return %c0_i32, %c0_i32_0 : i32, i32
  }
  func.func @transform_5(%arg0: i32) -> (i32, i32) {
    %c0_i32 = arith.constant 0 : i32
    %c0_i32_0 = arith.constant 0 : i32
    %c0_i32_1 = arith.constant 0 : i32
    return %c0_i32, %c0_i32_0 : i32, i32
  }
  func.func @transform_6(%arg0: i32) -> (i32, i32) {
    %c0_i32 = arith.constant 0 : i32
    %c0_i32_0 = arith.constant 0 : i32
    %c0_i32_1 = arith.constant 0 : i32
    return %c0_i32, %c0_i32_0 : i32, i32
  }
  func.func @transform_7(%arg0: i32) -> (i32, i32) {
    %c0_i32 = arith.constant 0 : i32
    %c0_i32_0 = arith.constant 0 : i32
    return %arg0, %c0_i32 : i32, i32
  }
}

</mosaic_0001>

<bundles_post_ra>
// kernel: tpu_custom_call.1
= control target key start
LH: loop header
LB: loop body
LE: loop exit
PB: predicated region body
PF: predicated region fallthrough
CT: control target
= control target key end

     0   :  { %12 = vsyncpa [#allocation3], 0  ;;  %s640_s0 = inlined_call_operand.vmem [shape: f32[8,32], index: 0, kind: input, shape index: {}]   ;;  %s641_s1 = inlined_call_operand.hbm [shape: f32[32,64], index: 1, kind: input, shape index: {}]   ;;  %s642_s2 = inlined_call_operand.vmem [shape: f32[1,64], index: 2, kind: input, shape index: {}]   ;;  %s643_s3 = inlined_call_operand.vmem [shape: f32[64,64], index: 3, kind: input, shape index: {}]   ;;  %s644_s4 = inlined_call_operand.vmem [shape: f32[1,64], index: 4, kind: input, shape index: {}]   ;;  %s645_s5 = inlined_call_operand.vmem [shape: f32[64,16], index: 5, kind: input, shape index: {}]   ;;  %s646_s6 = inlined_call_operand.vmem [shape: f32[1,16], index: 6, kind: input, shape index: {}]   ;;  %s647_s7 = inlined_call_operand.hbm [shape: f32[8,16], index: 7, kind: output, shape index: {}]  }
   0x1   :  { %13 = vsyncpa [#allocation4], 0  ;;  %s494_s24 = smov [#allocation2]   ;;  %s446_s28 = scalar_lea.hbm %s641_s1, 512 }
   0x2   :  { %s21_s25 = sshll.u32 %s494_s24, 4  ;;  %p447_p0 = scmp.ne.s32.totalorder %s641_s1, %s446_s28  ;;  %s22_s25 = int_to_ptr.vmem [resolvable:$true] %s21_s25 }
   0x3   :  { %p450_p1 = scmp.lt.u32.totalorder %s446_s28, %s641_s1 }
   0x5   :  { %p452_p2 = pnand %p450_p1, %p447_p0 }
   0x7   :  { %455 = shalt.err (!%p452_p2)
}
   0x8   :  { %s456_s10 = scalar_lea.vmem %s22_s25, 512  ;;  %p461_p4 = scmp.lt.s32.totalorder %s22_s25, %s22_s25 }
   0x9   :  { %p457_p3 = scmp.ne.s32.totalorder %s22_s25, %s456_s10  ;;  %p462_p5 = scmp.lt.s32.totalorder %s456_s10, %s456_s10 }
   0xb   :  { %p463_p6 = por %p462_p5, %p461_p4 }
   0xd   :  { %p464_p7 = pnand %p463_p6, %p457_p3 }
   0xf   :  { %467 = shalt.err (!%p464_p7)
}
  0x10   :  { %s495_s11 = smov 128   ;;  %s496_s12 = smov 8  }
  0x11   :  { %27 = dma.hbm_to_vmem [thread:$0]  %s641_s1, 512, %s22_s25, [#allocation3], %s495_s11, %s495_s11, %s496_s12  }
  0x12   :  { %490 = dma.done.wait [#allocation3], 512  }
  0x13   :  { %491 = vsyncadd [#allocation3], 4294966784  ;;  %v497_v0 = vmov 0.0|0.0   ;;  %vm498_vm0 = vmmov 0   ;;  %v499_v1 = vmov 0.0   ;;  %v42_v2 = vld [vmem:[#allocation2] sm:$0xff] }
  0x14   :  { %405 = vmatprep.subr.bf16.mxu0 %v497_v0  ;;  %364 = vmatprep.mubr.msk.f32.mxu0 %vm498_vm0, %v499_v1  ;;  %v43_v3 = vld [vmem:[#allocation2 + $0x8] sm:$0xff]  ;;  %v44_v4 = vld [vmem:[#allocation2 + $0x10] sm:$0xff]  ;;  %v45_v6 = vld [vmem:[#allocation2 + $0x18] sm:$0xff]  ;;  %vm53_vm1 = vcmask 261120   ;;  %vm143_vm2 = vcmask 523264   ;;  %vm310_vm3 = vcmask 130048  }
  0x15   :  { %411 = vmatprep.subr.bf16.mxu1 %v497_v0  ;;  %383 = vmatprep.mubr.msk.f32.mxu1 %vm498_vm0, %v499_v1  ;;  %v406_v5 = vpack.c.bf16 %v43_v3, %v42_v2  ;;  %v128_v7 = vld [vmem:[%s643_s3] sm:$0xff]  ;;  %v129_v8 = vld [vmem:[%s643_s3 + $0x8] sm:$0xff]  ;;  %v130_v9 = vld [vmem:[%s643_s3 + $0x10] sm:$0xff]  ;;  %v409_v11 = vpack.c.bf16 %v45_v6, %v44_v4 }
  0x16   :  { %v131_v10 = vld [vmem:[%s643_s3 + $0x18] sm:$0xff]  ;;  %v412_v12 = vpack.c.bf16 %v129_v8, %v128_v7  ;;  %v132_v14 = vld [vmem:[%s643_s3 + $0x20] sm:$0xff]  ;;  %v133_v15 = vld [vmem:[%s643_s3 + $0x28] sm:$0xff] }
  0x17   :  { %407 = vmatpush3.bf16.msra.mxu0 %v406_v5  ;;  %v415_v13 = vpack.c.bf16 %v131_v10, %v130_v9  ;;  %v41_v16 = vld [vmem:[%s640_s0] sm:$0xff]  ;;  %v418_v17 = vpack.c.bf16 %v133_v15, %v132_v14  ;;  %v134_v18 = vld [vmem:[%s643_s3 + $0x30] sm:$0xff]  ;;  %v135_v19 = vld [vmem:[%s643_s3 + $0x38] sm:$0xff] }
  0x18   :  { %408 = vmatprep.subr.bf16.mxu0 %v497_v0  ;;  %413 = vmatpush3.bf16.msra.mxu1 %v412_v12  ;;  %v421_v20 = vpack.c.bf16 %v135_v19, %v134_v18  ;;  %v218_v21 = vld [vmem:[%s645_s5] sm:$0xff]  ;;  %v219_v22 = vld [vmem:[%s645_s5 + $0x8] sm:$0xff]  ;;  %v220_v29 = vld [vmem:[%s645_s5 + $0x10] sm:$0xff] }
  0x19   :  { %414 = vmatprep.subr.bf16.mxu1 %v497_v0  ;;  %v424_v23 = vpack.c.bf16 %v219_v22, %v218_v21  ;;  %v327_v24 = vld [vmem:[%s642_s2] ss:$0 sm:$0xff]  ;;  %v221_v30 = vld [vmem:[%s645_s5 + $0x18] sm:$0xff]  ;;  %v223_v33 = vld [vmem:[%s645_s5 + $0x28] sm:$0xff] }
  0x1a   :  { %v427_v31 = vpack.c.bf16 %v221_v30, %v220_v29  ;;  %v222_v32 = vld [vmem:[%s645_s5 + $0x20] sm:$0xff]  ;;  %v224_v35 = vld [vmem:[%s645_s5 + $0x30] sm:$0xff]  ;;  %v225_v36 = vld [vmem:[%s645_s5 + $0x38] sm:$0xff]  ;;  %s500_s5 = smov [#allocation5]  }
  0x1b   :  { %410 = vmatpush3.bf16.msra.mxu0 %v409_v11  ;;  %v430_v34 = vpack.c.bf16 %v223_v33, %v222_v32  ;;  %v433_v37 = vpack.c.bf16 %v225_v36, %v224_v35  ;;  %v329_v38 = vld [vmem:[%s644_s4] ss:$0 sm:$0xff]  ;;  %s318_s27 = sshll.u32 %s500_s5, 4  ;;  %s319_s27 = int_to_ptr.vmem [resolvable:$true] %s318_s27 }
  0x1c   :  { %423 = vmatprep.subr.bf16.mxu0 %v497_v0  ;;  %416 = vmatpush3.bf16.msra.mxu1 %v415_v13  ;;  %v331_v43 = vld [vmem:[%s646_s6] ss:$0 sm:$0xff]  ;;  %s468_s4 = scalar_lea.vmem %s319_s27, 128  ;;  %p473_p9 = scmp.lt.s32.totalorder %s319_s27, %s319_s27 }
  0x1d   :  { %417 = vmatprep.subr.bf16.mxu1 %v497_v0  ;;  %p469_p8 = scmp.ne.s32.totalorder %s319_s27, %s468_s4  ;;  %p474_p10 = scmp.lt.s32.totalorder %s468_s4, %s468_s4 }
  0x1e   :  { %365 = vmatmul.mubr.msk.f32.vlgmr.msra.gmra.mrb[0].mxu0 %vm53_vm1, %v41_v16 }
  0x1f   :  { %402 = vmatprep.mubr.msk.f32.mxu0 %vm498_vm0, %v499_v1  ;;  %425 = vmatpush3.bf16.msra.mxu0 %v424_v23  ;;  %p475_p11 = por %p474_p10, %p473_p9 }
  0x20   :  { %419 = vmatpush3.bf16.msra.mxu1 %v418_v17  ;;  %426 = vmatprep.subr.bf16.mxu0 %v497_v0 }
  0x21   :  { %420 = vmatprep.subr.bf16.mxu1 %v497_v0  ;;  %p476_p12 = pnand %p475_p11, %p469_p8 }
  0x23   :  { %428 = vmatpush3.bf16.msra.mxu0 %v427_v31 }
  0x24   :  { %422 = vmatpush3.bf16.msra.mxu1 %v421_v20  ;;  %429 = vmatprep.subr.bf16.mxu0 %v497_v0 }
  0x27   :  { %431 = vmatpush3.bf16.msra.mxu0 %v430_v34 }
  0x28   :  { %432 = vmatprep.subr.bf16.mxu0 %v497_v0 }
  0x2b   :  { %434 = vmatpush3.bf16.msra.mxu0 %v433_v37 }
  0xf1   :  { %v123_v25 = vpop.f32.mrb[0].mxu0 }
  0xf2   :  { %v124_v26 = vadd.f32 %v327_v24, %v123_v25  ;;  %v366_v27 = vpop.f32.mrb[1].mxu0 }
  0xf4   :  { %v127_v28 = vmax.f32 %v124_v26, 0.0 }
  0xf6   :  { %384 = vmatmul.mubr.msk.f32.vlgmr.msra.gmra.mrb[0].mxu1 %vm143_vm2, %v127_v28 }
 0x1c9   :  { %v213_v39 = vpop.f32.mrb[0].mxu1 }
 0x1ca   :  { %v214_v40 = vadd.f32 %v329_v38, %v213_v39  ;;  %v385_v41 = vpop.f32.mrb[1].mxu1 }
 0x1cc   :  { %442 = vtanh.f32 %v214_v40 }
 0x1d6   :  { %v443_v42 = vpop.eup %442 }
 0x1d7   :  { %403 = vmatmul.mubr.msk.f32.vlgmr.msra.gmra.mrb[2].mxu0 %vm143_vm2, %v443_v42 }
 0x2aa   :  { %v302_v44 = vpop.f32.mrb[2].mxu0 }
 0x2ab   :  { %v303_v45 = vadd.f32 %v331_v43, %v302_v44  ;;  %v404_v46 = vpop.f32.mrb[3].mxu0 }
 0x2ad   :  { %v306_v47 = vmul.f32 0.5, %v303_v45 }
 0x2af   :  { %444 = vtanh.f32 %v306_v47 }
 0x2b9   :  { %v445_v48 = vpop.eup %444 }
 0x2ba   :  { %v308_v49 = vadd.f32 1.0, %v445_v48 }
 0x2bc   :  { %v309_v50 = vmul.f32 0.5, %v308_v49 }
 0x2be   :  { %311 = vst.msk [vmem:[#allocation5] sm:$0xff] %vm310_vm3, %v309_v50 }
 0x2bf   :  { %479 = shalt.err (!%p476_p12)
}
 0x2c0   :  { %s480_s29 = scalar_lea.hbm %s647_s7, 128 }
 0x2c1   :  { %p481_p13 = scmp.ne.s32.totalorder %s647_s7, %s480_s29  ;;  %p484_p0 = scmp.lt.u32.totalorder %s480_s29, %s647_s7 }
 0x2c3   :  { %p486_p1 = pnand %p484_p0, %p481_p13 }
 0x2c5   :  { %489 = shalt.err (!%p486_p1)
}
 0x2c6   :  { %321 = dma.vmem_to_hbm [thread:$0]  %s319_s27, 128, %s647_s7, [#allocation4]  }
 0x2c7   :  { %492 = dma.done.wait [#allocation4], 128  }
 0x2c8   :  { %493 = vsyncadd [#allocation4], 4294967168 }
 0x2c9   :  { %325 = vsyncpa [#allocation3], 1 }
 0x2ca   :  { %326 = vsyncpa [#allocation4], 1 }

</bundles_post_ra>
